<compile_context>
chip_gen: v6e
topology: v6e:2x2x1
jax: 0.10.0
libtpu: 0.0.40
codegen_flags: <defaults>
</compile_context>

<pallas_src>
import jax
import jax.numpy as jnp
from jax.experimental import pallas as pl
from jax.experimental.pallas import tpu as pltpu

# ----------------------------- model configuration -------------------------
BS = 8
CATE_NUNIQS = [10, 12, 8, 15, 9, 11]          # 6 categorical features
CATE_SIZE = len(CATE_NUNIQS)
NUME_SIZE = 4
DIM_EMB = 4
CROSS_DIM = CATE_SIZE * DIM_EMB + NUME_SIZE   # 28
MLP_HID = 32                                  # mlp_dim=[32]
DNN_DIMS = [32, 32, 32]                       # dnn_dim
CROSS_ENHANCE = 2                             # -> 2 enhancing-cross iterations
CROSS_CATE = 2                                # -> 1 final-cross iteration
NUM_CLASSES = 1
BN_EPS = 1e-5

assert CROSS_ENHANCE == 2 and CROSS_CATE == 2  # fusions below hardcode these

# ----------------------------- packed-parameter layout ---------------------
PD = 32                                       # padded feature dim (28 -> 32)
P_COLS = 128                                  # full-vreg lane width
V_TOTAL = sum(CATE_NUNIQS)                    # 65 embedding rows
V_PAD = 128                                   # one-hot lane width / table rows
assert V_TOTAL + NUME_SIZE <= V_PAD

R_EMB = 0                                     # [V_PAD, PD]   selector table
R_X0RHS = R_EMB + V_PAD                       # [PD, 96]      cross1_1 | w1 | w2
R_C1W1 = R_X0RHS + PD                         # [PD, PD]      cross1_2
R_MC = R_C1W1 + PD                            # [2*MLP_HID, 2*PD] block-diag
R_ENH = R_MC + 2 * MLP_HID                    # [PD, 64]      dnn1 | final cross
R_DW2 = R_ENH + PD                            # [32, 32]
R_DW3 = R_DW2 + DNN_DIMS[0]                   # [32, 32]
R_VEC = R_DW3 + DNN_DIMS[1]                   # vector rows (15 used)
P_ROWS = R_VEC + 16                           # pad vector block to 16 rows


# ----------------------------- Pallas kernel -------------------------------
def efnet_kernel(xs_ref, xd_ref, p_ref, out_ref):
    xs = xs_ref[0]                                        # [BS, CATE_SIZE] int32
    xd = xd_ref[0]                                        # [BS, NUME_SIZE] f32

    # --- in-kernel embedding lookup + concat + pad ---
    # Build a one-hot / value selector [BS, V_PAD] and do one MXU push against
    # the packed (block-diagonal) embedding + dense-identity table.
    col = jax.lax.broadcasted_iota(jnp.int32, (BS, V_PAD), 1)
    sel = jnp.zeros((BS, V_PAD), jnp.float32)
    off = 0
    for f in range(CATE_SIZE):
        sel = sel + jnp.where(col == (xs[:, f:f + 1] + off), 1.0, 0.0)
        off += CATE_NUNIQS[f]
    for j in range(NUME_SIZE):
        sel = sel + jnp.where(col == off + j, xd[:, j:j + 1], 0.0)
    x0 = jnp.dot(sel, p_ref[R_EMB:R_EMB + V_PAD, 0:PD],
                 preferred_element_type=jnp.float32)      # [BS, PD], lanes 28..31 == 0

    # one load for all the small per-feature vectors
    vecs = p_ref[R_VEC:R_VEC + 16, :]                     # [16, 128]
    c1b0 = vecs[0:1, 0:PD]
    c1b1 = vecs[1:2, 0:PD]
    g12 = vecs[2:3, 0:2 * MLP_HID]
    be12 = vecs[3:4, 0:2 * MLP_HID]
    mcb = vecs[4:5, 0:2 * PD]
    dg1, dg2, dg3 = vecs[5:6, 0:PD], vecs[6:7, 0:PD], vecs[7:8, 0:PD]
    dbe1, dbe2, dbe3 = vecs[8:9, 0:PD], vecs[9:10, 0:PD], vecs[10:11, 0:PD]
    cb = vecs[11:12, 0:PD]
    owc = vecs[12:13, 0:PD]
    owd = vecs[13:14, 0:DNN_DIMS[-1]]
    ob = vecs[14:15, 0:1]

    def bn_relu(h, g, b):
        # fused E[x], E[x^2] in one sublane reduction; biased variance
        # (training-mode BN over this micro-batch); guard var >= 0
        n = h.shape[1]
        s = jnp.mean(jnp.concatenate([h, h * h], axis=1), axis=0, keepdims=True)
        m = s[:, :n]
        var = jnp.maximum(s[:, n:] - m * m, 0.0)
        return jnp.maximum(g * (h - m) * jax.lax.rsqrt(var + BN_EPS) + b, 0.0)

    # --- fused x0 stage: one push for [cross1_1 | w1 | w2] ---
    r0 = jnp.dot(x0, p_ref[R_X0RHS:R_X0RHS + PD, :],
                 preferred_element_type=jnp.float32)      # [BS, 128]
    lin0 = r0[:, 0:PD]
    h12 = r0[:, PD:PD + 2 * MLP_HID]

    # enhancing cross: both branches use cross1_* and the same x0 -> cross1==cross2
    c1 = x0 * (lin0 + c1b0) + x0
    lin1 = jnp.dot(c1, p_ref[R_C1W1:R_C1W1 + PD, 0:PD],
                   preferred_element_type=jnp.float32)
    cross12 = x0 * (lin1 + c1b1) + c1

    # fused enhancing MLP branches (pre-BN biases dropped: cancel under BN)
    h12 = bn_relu(h12, g12, be12)
    mlp12 = jnp.dot(h12, p_ref[R_MC:R_MC + 2 * MLP_HID, 0:2 * PD],
                    preferred_element_type=jnp.float32) + mcb
    mlp_out1 = mlp12[:, 0:PD] * cross12
    mlp_out2 = mlp12[:, PD:2 * PD] * cross12

    weight = jax.nn.sigmoid(mlp_out2)
    enhance = weight * x0 + (1.0 - weight) * mlp_out1     # padding lanes stay 0

    # --- fused enhance stage: one push for [dnn layer-1 | final-cross weight] ---
    r1 = jnp.dot(enhance, p_ref[R_ENH:R_ENH + PD, 0:DNN_DIMS[0] + PD],
                 preferred_element_type=jnp.float32)      # [BS, 64]
    h = bn_relu(r1[:, 0:DNN_DIMS[0]], dg1, dbe1)
    crosslin = r1[:, DNN_DIMS[0]:DNN_DIMS[0] + PD]

    # remaining DNN tower (pre-BN biases dropped)
    h = bn_relu(jnp.dot(h, p_ref[R_DW2:R_DW2 + DNN_DIMS[0], 0:DNN_DIMS[1]],
                        preferred_element_type=jnp.float32), dg2, dbe2)
    h = bn_relu(jnp.dot(h, p_ref[R_DW3:R_DW3 + DNN_DIMS[1], 0:DNN_DIMS[2]],
                        preferred_element_type=jnp.float32), dg3, dbe3)
    dnn_out = h

    # final cross: range(1, cross_cate) -> exactly one iteration (CROSS_CATE==2)
    cross_out = enhance * (crosslin + cb) + enhance

    # output head: width-1 projection on the VPU + lane reduce (no MXU push)
    logits = (jnp.sum(cross_out * owc, axis=1, keepdims=True)
              + jnp.sum(dnn_out * owd, axis=1, keepdims=True)
              + ob)
    out_ref[0] = jax.nn.sigmoid(logits)


def efnet_forward(x_sparse, x_dense, packed_params):
    """x_sparse [N, BS, CATE_SIZE] int32, x_dense [N, BS, NUME_SIZE] f32."""
    n = x_sparse.shape[0]
    return pl.pallas_call(
        efnet_kernel,
        out_shape=jax.ShapeDtypeStruct((n, BS, NUM_CLASSES), jnp.float32),
        grid_spec=pltpu.PrefetchScalarGridSpec(
            num_scalar_prefetch=0,
            grid=(n,),
            in_specs=[
                pl.BlockSpec((1, BS, CATE_SIZE), lambda i: (i, 0, 0)),
                pl.BlockSpec((1, BS, NUME_SIZE), lambda i: (i, 0, 0)),
                # constant block index: param slab DMA'd once, VMEM-resident
                pl.BlockSpec((P_ROWS, P_COLS), lambda i: (0, 0)),
            ],
            out_specs=pl.BlockSpec((1, BS, NUM_CLASSES), lambda i: (i, 0, 0)),
        ),
        compiler_params=pltpu.CompilerParams(
            dimension_semantics=("parallel",)),   # v7x: split micro-batches over 2 TCs
    )(x_sparse, x_dense, packed_params)


# ----------------------------- parameter init ------------------------------
def init_params(key):
    keys = iter(jax.random.split(key, 128))

    def lin(in_f, out_f):
        bound = 1.0 / float(in_f) ** 0.5
        w = jax.random.uniform(next(keys), (in_f, out_f), jnp.float32, -bound, bound)
        b = jax.random.uniform(next(keys), (1, out_f), jnp.float32, -bound, bound)
        return w, b

    def bn(n):
        return jnp.ones((1, n), jnp.float32), jnp.zeros((1, n), jnp.float32)

    emb_tables = [jax.random.normal(next(keys), (v, DIM_EMB), jnp.float32)
                  for v in CATE_NUNIQS]

    c1 = [lin(CROSS_DIM, CROSS_DIM) for _ in range(CROSS_ENHANCE)]
    c1w = jnp.stack([w for w, _ in c1])                          # [CE, D, D]
    c1b = jnp.stack([b for _, b in c1])                          # [CE, 1, D]

    w1, b1 = lin(CROSS_DIM, MLP_HID); g1, be1 = bn(MLP_HID)
    mc1w, mc1b = lin(MLP_HID, CROSS_DIM)
    w2, b2 = lin(CROSS_DIM, MLP_HID); g2, be2 = bn(MLP_HID)
    mc2w, mc2b = lin(MLP_HID, CROSS_DIM)

    dnn = []
    in_f = CROSS_DIM
    for out_f in DNN_DIMS:
        w, b = lin(in_f, out_f)
        g, be = bn(out_f)
        dnn.extend([w, b, g, be])
        in_f = out_f

    cw, cb = lin(CROSS_DIM, CROSS_DIM)

    ow, ob = lin(CROSS_DIM + DNN_DIMS[-1], NUM_CLASSES)
    owc, owd = ow[:CROSS_DIM], ow[CROSS_DIM:]

    flat = [c1w, c1b,
            w1, b1, g1, be1, mc1w, mc1b,
            w2, b2, g2, be2, mc2w, mc2b,
            *dnn,
            cw, cb, owc, owd, ob]
    return emb_tables, flat


# ----------------------------- parameter packing ---------------------------
def pack_params(emb_tables, flat):
    (c1w, c1b, w1, _b1, g1, be1, mc1w, mc1b,
     w2, _b2, g2, be2, mc2w, mc2b,
     dw1, _db1, dg1, dbe1, dw2, _db2, dg2, dbe2, dw3, _db3, dg3, dbe3,
     cw, cb, owc, owd, ob) = flat

    D = CROSS_DIM
    P = jnp.zeros((P_ROWS, P_COLS), jnp.float32)

    def put(P, r, c, a):
        return P.at[r:r + a.shape[0], c:c + a.shape[1]].set(a)

    # block-diagonal embedding tables + dense-identity rows (selector table)
    off = 0
    for f, tab in enumerate(emb_tables):
        P = put(P, R_EMB + off, f * DIM_EMB, tab)
        off += tab.shape[0]
    for j in range(NUME_SIZE):
        P = P.at[R_EMB + off + j, CATE_SIZE * DIM_EMB + j].set(1.0)

    # fused x0 RHS: cross1_1 weight | [w1 w2]  (pre-BN biases dropped)
    P = put(P, R_X0RHS, 0, c1w[0])
    P = put(P, R_X0RHS, PD, jnp.concatenate([w1, w2], axis=1))    # cols 32:96
    # second enhancing-cross weight (used for both branches)
    P = put(P, R_C1W1, 0, c1w[1])
    # block-diagonal second MLP layer
    P = put(P, R_MC, 0, mc1w)                                     # rows 0..31, cols 0..27
    P = put(P, R_MC + MLP_HID, PD, mc2w)                          # rows 32..63, cols 32..59
    # fused enhance RHS: DNN layer-1 | final-cross weight
    P = put(P, R_ENH, 0, dw1)
    P = put(P, R_ENH, DNN_DIMS[0], cw)                            # cols 32:60
    # DNN layers 2, 3 (pre-BN biases dropped)
    P = put(P, R_DW2, 0, dw2)
    P = put(P, R_DW3, 0, dw3)
    # vector rows
    P = put(P, R_VEC + 0, 0, c1b[0])
    P = put(P, R_VEC + 1, 0, c1b[1])
    P = put(P, R_VEC + 2, 0, jnp.concatenate([g1, g2], axis=1))
    P = put(P, R_VEC + 3, 0, jnp.concatenate([be1, be2], axis=1))
    mcb = jnp.zeros((1, 2 * PD), jnp.float32)
    mcb = mcb.at[:, :D].set(mc1b).at[:, PD:PD + D].set(mc2b)
    P = put(P, R_VEC + 4, 0, mcb)
    P = put(P, R_VEC + 5, 0, dg1); P = put(P, R_VEC + 6, 0, dg2); P = put(P, R_VEC + 7, 0, dg3)
    P = put(P, R_VEC + 8, 0, dbe1); P = put(P, R_VEC + 9, 0, dbe2); P = put(P, R_VEC + 10, 0, dbe3)
    P = put(P, R_VEC + 11, 0, cb)
    P = put(P, R_VEC + 12, 0, owc.T)                              # [1, 28]
    P = put(P, R_VEC + 13, 0, owd.T)                              # [1, 32]
    P = put(P, R_VEC + 14, 0, ob)                                 # [1, 1]
    return P


# ----------------------------- plain-JAX reference -------------------------
def efnet_reference(feat, p):
    """feat: [BS, CROSS_DIM] for one micro-batch (BN stats over these BS rows)."""
    hp = dict(precision=jax.lax.Precision.HIGHEST)
    (c1w, c1b, w1, b1, g1, be1, mc1w, mc1b,
     w2, b2, g2, be2, mc2w, mc2b,
     dw1, db1, dg1, dbe1, dw2, db2, dg2, dbe2, dw3, db3, dg3, dbe3,
     cw, cb, owc, owd, ob) = p

    def bn_relu(h, g, be):
        m = jnp.mean(h, axis=0, keepdims=True)
        v = jnp.mean((h - m) ** 2, axis=0, keepdims=True)
        return jnp.maximum(g * (h - m) / jnp.sqrt(v + BN_EPS) + be, 0.0)

    x0 = feat

    def enh(x):
        c = x
        for i in range(CROSS_ENHANCE):
            c = x * (jnp.dot(c, c1w[i], **hp) + c1b[i]) + c
        return c

    cross1, cross2 = enh(x0), enh(x0)
    m1 = jnp.dot(bn_relu(jnp.dot(x0, w1, **hp) + b1, g1, be1), mc1w, **hp) + mc1b
    m2 = jnp.dot(bn_relu(jnp.dot(x0, w2, **hp) + b2, g2, be2), mc2w, **hp) + mc2b
    m1, m2 = m1 * cross1, m2 * cross2
    w = jax.nn.sigmoid(m2)
    enhance_fea = w * x0 + (1.0 - w) * m1

    h = enhance_fea
    for (dw, db, dg, dbe) in ((dw1, db1, dg1, dbe1), (dw2, db2, dg2, dbe2), (dw3, db3, dg3, dbe3)):
        h = bn_relu(jnp.dot(h, dw, **hp) + db, dg, dbe)
    dnn_out = h

    c = enhance_fea
    for _ in range(CROSS_CATE - 1):
        c = enhance_fea * (jnp.dot(c, cw, **hp) + cb) + c
    logits = jnp.dot(c, owc, **hp) + jnp.dot(dnn_out, owd, **hp) + ob
    return jax.nn.sigmoid(logits)


# ----------------------------- main -----------------------------------------
if __name__ == "__main__":
    key = jax.random.PRNGKey(0)
    k_param, k_sparse, k_dense = jax.random.split(key, 3)

    emb_tables, flat_params = init_params(k_param)
    packed = pack_params(emb_tables, flat_params)

    # N independent micro-batches of BS=8 processed by one pallas_call
    N = 4
    sparse_keys = jax.random.split(k_sparse, CATE_SIZE)
    x_sparse = jnp.stack(
        [jax.random.randint(sparse_keys[i], (N, BS), 0, CATE_NUNIQS[i])
         for i in range(CATE_SIZE)], axis=-1)              # [N, BS, CATE_SIZE] int32
    x_dense = jax.random.normal(k_dense, (N, BS, NUME_SIZE), jnp.float32)

    out = jax.block_until_ready(efnet_forward(x_sparse, x_dense, packed))

    # reference path (embedding gather done in plain JAX only for validation)
    emb_cate = jnp.concatenate(
        [jnp.take(emb_tables[i], x_sparse[..., i], axis=0) for i in range(CATE_SIZE)],
        axis=-1)                                           # [N, BS, 24]
    feat = jnp.concatenate([emb_cate, x_dense], axis=-1)   # [N, BS, 28]
    ref = jax.block_until_ready(jax.vmap(lambda f: efnet_reference(f, flat_params))(feat))

    assert out.shape == (N, BS, NUM_CLASSES)
    assert jnp.allclose(out, ref, atol=1e-3, rtol=1e-3), (out, ref)

    print("KERNEL_OK")
</pallas_src>

<mosaic_0001>
module attributes {stable_mosaic.version = 11 : i64} {
  func.func @efnet_kernel(%arg0: i32, %arg1: memref<1x8x6xi32, #tpu.memory_space<vmem>>, %arg2: memref<1x8x4xf32, #tpu.memory_space<vmem>>, %arg3: memref<368x128xf32, #tpu.memory_space<vmem>>, %arg4: memref<1x8x1xf32, #tpu.memory_space<vmem>>) attributes {dimension_semantics = [#tpu.dimension_semantics<parallel>], iteration_bounds = array<i64: 4>, scalar_prefetch = 0 : i64, scratch_operands = 0 : i64, tpu.core_type = #tpu.core_type<tc>, window_params = [{transform_indices = @transform_0, window_bounds = array<i64: 1, 8, 6>}, {transform_indices = @transform_1, window_bounds = array<i64: 1, 8, 4>}, {pipeline_mode = #tpu.pipeline_mode<synchronous>, transform_indices = @transform_2, window_bounds = array<i64: 368, 128>}, {transform_indices = @transform_3, window_bounds = array<i64: 1, 8, 1>}]} {
    %c0 = arith.constant 0 : index
    %c0_0 = arith.constant 0 : index
    %c0_1 = arith.constant 0 : index
    %0 = vector.load %arg1[%c0, %c0_0, %c0_1] : memref<1x8x6xi32, #tpu.memory_space<vmem>>, vector<1x8x6xi32>
    %1 = vector.shape_cast %0 : vector<1x8x6xi32> to vector<8x6xi32>
    %c0_2 = arith.constant 0 : index
    %c0_3 = arith.constant 0 : index
    %c0_4 = arith.constant 0 : index
    %2 = vector.load %arg2[%c0_2, %c0_3, %c0_4] : memref<1x8x4xf32, #tpu.memory_space<vmem>>, vector<1x8x4xf32>
    %3 = vector.shape_cast %2 : vector<1x8x4xf32> to vector<8x4xf32>
    %4 = tpu.iota {dimensions = array<i32: 1>} : vector<8x128xi32>
    %cst = arith.constant 0.000000e+00 : f32
    %5 = vector.broadcast %cst : f32 to vector<8x128xf32>
    %6 = vector.extract_strided_slice %1 {offsets = [0, 0], sizes = [8, 1], strides = [1, 1]} : vector<8x6xi32> to vector<8x1xi32>
    %c0_i32 = arith.constant 0 : i32
    %7 = vector.broadcast %c0_i32 : i32 to vector<8x1xi32>
    %8 = arith.addi %6, %7 : vector<8x1xi32>
    %9 = vector.broadcast %8 : vector<8x1xi32> to vector<8x128xi32>
    %10 = arith.cmpi eq, %4, %9 : vector<8x128xi32>
    %cst_5 = arith.constant 1.000000e+00 : f32
    %cst_6 = arith.constant 0.000000e+00 : f32
    %11 = vector.broadcast %cst_5 : f32 to vector<8x128xf32>
    %12 = vector.broadcast %cst_6 : f32 to vector<8x128xf32>
    %13 = arith.select %10, %11, %12 : vector<8x128xi1>, vector<8x128xf32>
    %14 = arith.addf %5, %13 : vector<8x128xf32>
    %15 = vector.extract_strided_slice %1 {offsets = [0, 1], sizes = [8, 1], strides = [1, 1]} : vector<8x6xi32> to vector<8x1xi32>
    %c10_i32 = arith.constant 10 : i32
    %16 = vector.broadcast %c10_i32 : i32 to vector<8x1xi32>
    %17 = arith.addi %15, %16 : vector<8x1xi32>
    %18 = vector.broadcast %17 : vector<8x1xi32> to vector<8x128xi32>
    %19 = arith.cmpi eq, %4, %18 : vector<8x128xi32>
    %cst_7 = arith.constant 1.000000e+00 : f32
    %cst_8 = arith.constant 0.000000e+00 : f32
    %20 = vector.broadcast %cst_7 : f32 to vector<8x128xf32>
    %21 = vector.broadcast %cst_8 : f32 to vector<8x128xf32>
    %22 = arith.select %19, %20, %21 : vector<8x128xi1>, vector<8x128xf32>
    %23 = arith.addf %14, %22 : vector<8x128xf32>
    %24 = vector.extract_strided_slice %1 {offsets = [0, 2], sizes = [8, 1], strides = [1, 1]} : vector<8x6xi32> to vector<8x1xi32>
    %c22_i32 = arith.constant 22 : i32
    %25 = vector.broadcast %c22_i32 : i32 to vector<8x1xi32>
    %26 = arith.addi %24, %25 : vector<8x1xi32>
    %27 = vector.broadcast %26 : vector<8x1xi32> to vector<8x128xi32>
    %28 = arith.cmpi eq, %4, %27 : vector<8x128xi32>
    %cst_9 = arith.constant 1.000000e+00 : f32
    %cst_10 = arith.constant 0.000000e+00 : f32
    %29 = vector.broadcast %cst_9 : f32 to vector<8x128xf32>
    %30 = vector.broadcast %cst_10 : f32 to vector<8x128xf32>
    %31 = arith.select %28, %29, %30 : vector<8x128xi1>, vector<8x128xf32>
    %32 = arith.addf %23, %31 : vector<8x128xf32>
    %33 = vector.extract_strided_slice %1 {offsets = [0, 3], sizes = [8, 1], strides = [1, 1]} : vector<8x6xi32> to vector<8x1xi32>
    %c30_i32 = arith.constant 30 : i32
    %34 = vector.broadcast %c30_i32 : i32 to vector<8x1xi32>
    %35 = arith.addi %33, %34 : vector<8x1xi32>
    %36 = vector.broadcast %35 : vector<8x1xi32> to vector<8x128xi32>
    %37 = arith.cmpi eq, %4, %36 : vector<8x128xi32>
    %cst_11 = arith.constant 1.000000e+00 : f32
    %cst_12 = arith.constant 0.000000e+00 : f32
    %38 = vector.broadcast %cst_11 : f32 to vector<8x128xf32>
    %39 = vector.broadcast %cst_12 : f32 to vector<8x128xf32>
    %40 = arith.select %37, %38, %39 : vector<8x128xi1>, vector<8x128xf32>
    %41 = arith.addf %32, %40 : vector<8x128xf32>
    %42 = vector.extract_strided_slice %1 {offsets = [0, 4], sizes = [8, 1], strides = [1, 1]} : vector<8x6xi32> to vector<8x1xi32>
    %c45_i32 = arith.constant 45 : i32
    %43 = vector.broadcast %c45_i32 : i32 to vector<8x1xi32>
    %44 = arith.addi %42, %43 : vector<8x1xi32>
    %45 = vector.broadcast %44 : vector<8x1xi32> to vector<8x128xi32>
    %46 = arith.cmpi eq, %4, %45 : vector<8x128xi32>
    %cst_13 = arith.constant 1.000000e+00 : f32
    %cst_14 = arith.constant 0.000000e+00 : f32
    %47 = vector.broadcast %cst_13 : f32 to vector<8x128xf32>
    %48 = vector.broadcast %cst_14 : f32 to vector<8x128xf32>
    %49 = arith.select %46, %47, %48 : vector<8x128xi1>, vector<8x128xf32>
    %50 = arith.addf %41, %49 : vector<8x128xf32>
    %51 = vector.extract_strided_slice %1 {offsets = [0, 5], sizes = [8, 1], strides = [1, 1]} : vector<8x6xi32> to vector<8x1xi32>
    %c54_i32 = arith.constant 54 : i32
    %52 = vector.broadcast %c54_i32 : i32 to vector<8x1xi32>
    %53 = arith.addi %51, %52 : vector<8x1xi32>
    %54 = vector.broadcast %53 : vector<8x1xi32> to vector<8x128xi32>
    %55 = arith.cmpi eq, %4, %54 : vector<8x128xi32>
    %cst_15 = arith.constant 1.000000e+00 : f32
    %cst_16 = arith.constant 0.000000e+00 : f32
    %56 = vector.broadcast %cst_15 : f32 to vector<8x128xf32>
    %57 = vector.broadcast %cst_16 : f32 to vector<8x128xf32>
    %58 = arith.select %55, %56, %57 : vector<8x128xi1>, vector<8x128xf32>
    %59 = arith.addf %50, %58 : vector<8x128xf32>
    %c65_i32 = arith.constant 65 : i32
    %60 = vector.broadcast %c65_i32 : i32 to vector<8x128xi32>
    %61 = arith.cmpi eq, %4, %60 : vector<8x128xi32>
    %62 = vector.extract_strided_slice %3 {offsets = [0, 0], sizes = [8, 1], strides = [1, 1]} : vector<8x4xf32> to vector<8x1xf32>
    %cst_17 = arith.constant 0.000000e+00 : f32
    %63 = vector.shape_cast %62 : vector<8x1xf32> to vector<8x1xf32>
    %64 = vector.broadcast %63 : vector<8x1xf32> to vector<8x128xf32>
    %65 = vector.broadcast %cst_17 : f32 to vector<8x128xf32>
    %66 = arith.select %61, %64, %65 : vector<8x128xi1>, vector<8x128xf32>
    %67 = arith.addf %59, %66 : vector<8x128xf32>
    %c66_i32 = arith.constant 66 : i32
    %68 = vector.broadcast %c66_i32 : i32 to vector<8x128xi32>
    %69 = arith.cmpi eq, %4, %68 : vector<8x128xi32>
    %70 = vector.extract_strided_slice %3 {offsets = [0, 1], sizes = [8, 1], strides = [1, 1]} : vector<8x4xf32> to vector<8x1xf32>
    %cst_18 = arith.constant 0.000000e+00 : f32
    %71 = vector.shape_cast %70 : vector<8x1xf32> to vector<8x1xf32>
    %72 = vector.broadcast %71 : vector<8x1xf32> to vector<8x128xf32>
    %73 = vector.broadcast %cst_18 : f32 to vector<8x128xf32>
    %74 = arith.select %69, %72, %73 : vector<8x128xi1>, vector<8x128xf32>
    %75 = arith.addf %67, %74 : vector<8x128xf32>
    %c67_i32 = arith.constant 67 : i32
    %76 = vector.broadcast %c67_i32 : i32 to vector<8x128xi32>
    %77 = arith.cmpi eq, %4, %76 : vector<8x128xi32>
    %78 = vector.extract_strided_slice %3 {offsets = [0, 2], sizes = [8, 1], strides = [1, 1]} : vector<8x4xf32> to vector<8x1xf32>
    %cst_19 = arith.constant 0.000000e+00 : f32
    %79 = vector.shape_cast %78 : vector<8x1xf32> to vector<8x1xf32>
    %80 = vector.broadcast %79 : vector<8x1xf32> to vector<8x128xf32>
    %81 = vector.broadcast %cst_19 : f32 to vector<8x128xf32>
    %82 = arith.select %77, %80, %81 : vector<8x128xi1>, vector<8x128xf32>
    %83 = arith.addf %75, %82 : vector<8x128xf32>
    %c68_i32 = arith.constant 68 : i32
    %84 = vector.broadcast %c68_i32 : i32 to vector<8x128xi32>
    %85 = arith.cmpi eq, %4, %84 : vector<8x128xi32>
    %86 = vector.extract_strided_slice %3 {offsets = [0, 3], sizes = [8, 1], strides = [1, 1]} : vector<8x4xf32> to vector<8x1xf32>
    %cst_20 = arith.constant 0.000000e+00 : f32
    %87 = vector.shape_cast %86 : vector<8x1xf32> to vector<8x1xf32>
    %88 = vector.broadcast %87 : vector<8x1xf32> to vector<8x128xf32>
    %89 = vector.broadcast %cst_20 : f32 to vector<8x128xf32>
    %90 = arith.select %85, %88, %89 : vector<8x128xi1>, vector<8x128xf32>
    %91 = arith.addf %83, %90 : vector<8x128xf32>
    %c0_21 = arith.constant 0 : index
    %c0_22 = arith.constant 0 : index
    %92 = vector.load %arg3[%c0_21, %c0_22] : memref<368x128xf32, #tpu.memory_space<vmem>>, vector<128x32xf32>
    %cst_23 = arith.constant dense<0.000000e+00> : vector<8x32xf32>
    %93 = tpu.matmul %91, %92, %cst_23 {dimension_numbers = #tpu.dot_dimension_numbers<[1], [0], [0], [1], [0, 0, 1, 1], [], []>} : vector<8x128xf32>, vector<128x32xf32>, vector<8x32xf32> -> vector<8x32xf32>
    %c352 = arith.constant 352 : index
    %c0_24 = arith.constant 0 : index
    %94 = vector.load %arg3[%c352, %c0_24] : memref<368x128xf32, #tpu.memory_space<vmem>>, vector<16x128xf32>
    %95 = vector.extract_strided_slice %94 {offsets = [0, 0], sizes = [1, 32], strides = [1, 1]} : vector<16x128xf32> to vector<1x32xf32>
    %96 = vector.extract_strided_slice %94 {offsets = [1, 0], sizes = [1, 32], strides = [1, 1]} : vector<16x128xf32> to vector<1x32xf32>
    %97 = vector.extract_strided_slice %94 {offsets = [2, 0], sizes = [1, 64], strides = [1, 1]} : vector<16x128xf32> to vector<1x64xf32>
    %98 = vector.extract_strided_slice %94 {offsets = [3, 0], sizes = [1, 64], strides = [1, 1]} : vector<16x128xf32> to vector<1x64xf32>
    %99 = vector.extract_strided_slice %94 {offsets = [4, 0], sizes = [1, 64], strides = [1, 1]} : vector<16x128xf32> to vector<1x64xf32>
    %100 = vector.extract_strided_slice %94 {offsets = [5, 0], sizes = [1, 32], strides = [1, 1]} : vector<16x128xf32> to vector<1x32xf32>
    %101 = vector.extract_strided_slice %94 {offsets = [6, 0], sizes = [1, 32], strides = [1, 1]} : vector<16x128xf32> to vector<1x32xf32>
    %102 = vector.extract_strided_slice %94 {offsets = [7, 0], sizes = [1, 32], strides = [1, 1]} : vector<16x128xf32> to vector<1x32xf32>
    %103 = vector.extract_strided_slice %94 {offsets = [8, 0], sizes = [1, 32], strides = [1, 1]} : vector<16x128xf32> to vector<1x32xf32>
    %104 = vector.extract_strided_slice %94 {offsets = [9, 0], sizes = [1, 32], strides = [1, 1]} : vector<16x128xf32> to vector<1x32xf32>
    %105 = vector.extract_strided_slice %94 {offsets = [10, 0], sizes = [1, 32], strides = [1, 1]} : vector<16x128xf32> to vector<1x32xf32>
    %106 = vector.extract_strided_slice %94 {offsets = [11, 0], sizes = [1, 32], strides = [1, 1]} : vector<16x128xf32> to vector<1x32xf32>
    %107 = vector.extract_strided_slice %94 {offsets = [12, 0], sizes = [1, 32], strides = [1, 1]} : vector<16x128xf32> to vector<1x32xf32>
    %108 = vector.extract_strided_slice %94 {offsets = [13, 0], sizes = [1, 32], strides = [1, 1]} : vector<16x128xf32> to vector<1x32xf32>
    %109 = vector.extract_strided_slice %94 {offsets = [14, 0], sizes = [1, 1], strides = [1, 1]} : vector<16x128xf32> to vector<1x1xf32>
    %c128 = arith.constant 128 : index
    %c0_25 = arith.constant 0 : index
    %110 = vector.load %arg3[%c128, %c0_25] : memref<368x128xf32, #tpu.memory_space<vmem>>, vector<32x128xf32>
    %cst_26 = arith.constant dense<0.000000e+00> : vector<8x128xf32>
    %111 = tpu.matmul %93, %110, %cst_26 {dimension_numbers = #tpu.dot_dimension_numbers<[1], [0], [0], [1], [0, 0, 1, 1], [], []>} : vector<8x32xf32>, vector<32x128xf32>, vector<8x128xf32> -> vector<8x128xf32>
    %112 = vector.extract_strided_slice %111 {offsets = [0, 0], sizes = [8, 32], strides = [1, 1]} : vector<8x128xf32> to vector<8x32xf32>
    %113 = vector.extract_strided_slice %111 {offsets = [0, 32], sizes = [8, 64], strides = [1, 1]} : vector<8x128xf32> to vector<8x64xf32>
    %114 = vector.broadcast %95 : vector<1x32xf32> to vector<8x32xf32>
    %115 = arith.addf %112, %114 : vector<8x32xf32>
    %116 = arith.mulf %93, %115 : vector<8x32xf32>
    %117 = arith.addf %116, %93 : vector<8x32xf32>
    %c160 = arith.constant 160 : index
    %c0_27 = arith.constant 0 : index
    %118 = vector.load %arg3[%c160, %c0_27] : memref<368x128xf32, #tpu.memory_space<vmem>>, vector<32x32xf32>
    %cst_28 = arith.constant dense<0.000000e+00> : vector<8x32xf32>
    %119 = tpu.matmul %117, %118, %cst_28 {dimension_numbers = #tpu.dot_dimension_numbers<[1], [0], [0], [1], [0, 0, 1, 1], [], []>} : vector<8x32xf32>, vector<32x32xf32>, vector<8x32xf32> -> vector<8x32xf32>
    %120 = vector.broadcast %96 : vector<1x32xf32> to vector<8x32xf32>
    %121 = arith.addf %119, %120 : vector<8x32xf32>
    %122 = arith.mulf %93, %121 : vector<8x32xf32>
    %123 = arith.addf %122, %117 : vector<8x32xf32>
    %124 = arith.mulf %113, %113 : vector<8x64xf32>
    %125 = tpu.concatenate %113, %124 in 1 : vector<8x64xf32>, vector<8x64xf32> -> vector<8x128xf32>
    %cst_29 = arith.constant dense<0.000000e+00> : vector<128xf32>
    %126 = vector.multi_reduction <add>, %125, %cst_29 [0] : vector<8x128xf32> to vector<128xf32>
    %127 = vector.shape_cast %126 : vector<128xf32> to vector<1x128xf32>
    %cst_30 = arith.constant 8.000000e+00 : f32
    %128 = vector.broadcast %cst_30 : f32 to vector<1x128xf32>
    %129 = arith.divf %127, %128 : vector<1x128xf32>
    %130 = vector.extract_strided_slice %129 {offsets = [0, 0], sizes = [1, 64], strides = [1, 1]} : vector<1x128xf32> to vector<1x64xf32>
    %131 = vector.extract_strided_slice %129 {offsets = [0, 64], sizes = [1, 64], strides = [1, 1]} : vector<1x128xf32> to vector<1x64xf32>
    %132 = arith.mulf %130, %130 : vector<1x64xf32>
    %133 = arith.subf %131, %132 : vector<1x64xf32>
    %cst_31 = arith.constant 0.000000e+00 : f32
    %134 = vector.broadcast %cst_31 : f32 to vector<1x64xf32>
    %135 = arith.maximumf %133, %134 : vector<1x64xf32>
    %136 = vector.broadcast %130 : vector<1x64xf32> to vector<8x64xf32>
    %137 = arith.subf %113, %136 : vector<8x64xf32>
    %138 = vector.broadcast %97 : vector<1x64xf32> to vector<8x64xf32>
    %139 = arith.mulf %138, %137 : vector<8x64xf32>
    %cst_32 = arith.constant 9.99999974E-6 : f32
    %140 = vector.broadcast %cst_32 : f32 to vector<1x64xf32>
    %141 = arith.addf %135, %140 : vector<1x64xf32>
    %142 = math.rsqrt %141 : vector<1x64xf32>
    %143 = vector.broadcast %142 : vector<1x64xf32> to vector<8x64xf32>
    %144 = arith.mulf %139, %143 : vector<8x64xf32>
    %145 = vector.broadcast %98 : vector<1x64xf32> to vector<8x64xf32>
    %146 = arith.addf %144, %145 : vector<8x64xf32>
    %cst_33 = arith.constant 0.000000e+00 : f32
    %147 = vector.broadcast %cst_33 : f32 to vector<8x64xf32>
    %148 = arith.maximumf %146, %147 : vector<8x64xf32>
    %c192 = arith.constant 192 : index
    %c0_34 = arith.constant 0 : index
    %149 = vector.load %arg3[%c192, %c0_34] : memref<368x128xf32, #tpu.memory_space<vmem>>, vector<64x64xf32>
    %cst_35 = arith.constant dense<0.000000e+00> : vector<8x64xf32>
    %150 = tpu.matmul %148, %149, %cst_35 {dimension_numbers = #tpu.dot_dimension_numbers<[1], [0], [0], [1], [0, 0, 1, 1], [], []>} : vector<8x64xf32>, vector<64x64xf32>, vector<8x64xf32> -> vector<8x64xf32>
    %151 = vector.broadcast %99 : vector<1x64xf32> to vector<8x64xf32>
    %152 = arith.addf %150, %151 : vector<8x64xf32>
    %153 = vector.extract_strided_slice %152 {offsets = [0, 0], sizes = [8, 32], strides = [1, 1]} : vector<8x64xf32> to vector<8x32xf32>
    %154 = arith.mulf %153, %123 : vector<8x32xf32>
    %155 = vector.extract_strided_slice %152 {offsets = [0, 32], sizes = [8, 32], strides = [1, 1]} : vector<8x64xf32> to vector<8x32xf32>
    %156 = arith.mulf %155, %123 : vector<8x32xf32>
    %157 = arith.negf %156 : vector<8x32xf32>
    %158 = math.exp %157 : vector<8x32xf32>
    %cst_36 = arith.constant 1.000000e+00 : f32
    %159 = vector.broadcast %cst_36 : f32 to vector<8x32xf32>
    %160 = arith.addf %159, %158 : vector<8x32xf32>
    %161 = arith.divf %159, %160 : vector<8x32xf32>
    %162 = arith.mulf %161, %93 : vector<8x32xf32>
    %cst_37 = arith.constant 1.000000e+00 : f32
    %163 = vector.broadcast %cst_37 : f32 to vector<8x32xf32>
    %164 = arith.subf %163, %161 : vector<8x32xf32>
    %165 = arith.mulf %164, %154 : vector<8x32xf32>
    %166 = arith.addf %162, %165 : vector<8x32xf32>
    %c256 = arith.constant 256 : index
    %c0_38 = arith.constant 0 : index
    %167 = vector.load %arg3[%c256, %c0_38] : memref<368x128xf32, #tpu.memory_space<vmem>>, vector<32x64xf32>
    %cst_39 = arith.constant dense<0.000000e+00> : vector<8x64xf32>
    %168 = tpu.matmul %166, %167, %cst_39 {dimension_numbers = #tpu.dot_dimension_numbers<[1], [0], [0], [1], [0, 0, 1, 1], [], []>} : vector<8x32xf32>, vector<32x64xf32>, vector<8x64xf32> -> vector<8x64xf32>
    %169 = vector.extract_strided_slice %168 {offsets = [0, 0], sizes = [8, 32], strides = [1, 1]} : vector<8x64xf32> to vector<8x32xf32>
    %170 = arith.mulf %169, %169 : vector<8x32xf32>
    %171 = tpu.concatenate %169, %170 in 1 : vector<8x32xf32>, vector<8x32xf32> -> vector<8x64xf32>
    %cst_40 = arith.constant dense<0.000000e+00> : vector<64xf32>
    %172 = vector.multi_reduction <add>, %171, %cst_40 [0] : vector<8x64xf32> to vector<64xf32>
    %173 = vector.shape_cast %172 : vector<64xf32> to vector<1x64xf32>
    %cst_41 = arith.constant 8.000000e+00 : f32
    %174 = vector.broadcast %cst_41 : f32 to vector<1x64xf32>
    %175 = arith.divf %173, %174 : vector<1x64xf32>
    %176 = vector.extract_strided_slice %175 {offsets = [0, 0], sizes = [1, 32], strides = [1, 1]} : vector<1x64xf32> to vector<1x32xf32>
    %177 = vector.extract_strided_slice %175 {offsets = [0, 32], sizes = [1, 32], strides = [1, 1]} : vector<1x64xf32> to vector<1x32xf32>
    %178 = arith.mulf %176, %176 : vector<1x32xf32>
    %179 = arith.subf %177, %178 : vector<1x32xf32>
    %cst_42 = arith.constant 0.000000e+00 : f32
    %180 = vector.broadcast %cst_42 : f32 to vector<1x32xf32>
    %181 = arith.maximumf %179, %180 : vector<1x32xf32>
    %182 = vector.broadcast %176 : vector<1x32xf32> to vector<8x32xf32>
    %183 = arith.subf %169, %182 : vector<8x32xf32>
    %184 = vector.broadcast %100 : vector<1x32xf32> to vector<8x32xf32>
    %185 = arith.mulf %184, %183 : vector<8x32xf32>
    %cst_43 = arith.constant 9.99999974E-6 : f32
    %186 = vector.broadcast %cst_43 : f32 to vector<1x32xf32>
    %187 = arith.addf %181, %186 : vector<1x32xf32>
    %188 = math.rsqrt %187 : vector<1x32xf32>
    %189 = vector.broadcast %188 : vector<1x32xf32> to vector<8x32xf32>
    %190 = arith.mulf %185, %189 : vector<8x32xf32>
    %191 = vector.broadcast %103 : vector<1x32xf32> to vector<8x32xf32>
    %192 = arith.addf %190, %191 : vector<8x32xf32>
    %cst_44 = arith.constant 0.000000e+00 : f32
    %193 = vector.broadcast %cst_44 : f32 to vector<8x32xf32>
    %194 = arith.maximumf %192, %193 : vector<8x32xf32>
    %195 = vector.extract_strided_slice %168 {offsets = [0, 32], sizes = [8, 32], strides = [1, 1]} : vector<8x64xf32> to vector<8x32xf32>
    %c288 = arith.constant 288 : index
    %c0_45 = arith.constant 0 : index
    %196 = vector.load %arg3[%c288, %c0_45] : memref<368x128xf32, #tpu.memory_space<vmem>>, vector<32x32xf32>
    %cst_46 = arith.constant dense<0.000000e+00> : vector<8x32xf32>
    %197 = tpu.matmul %194, %196, %cst_46 {dimension_numbers = #tpu.dot_dimension_numbers<[1], [0], [0], [1], [0, 0, 1, 1], [], []>} : vector<8x32xf32>, vector<32x32xf32>, vector<8x32xf32> -> vector<8x32xf32>
    %198 = arith.mulf %197, %197 : vector<8x32xf32>
    %199 = tpu.concatenate %197, %198 in 1 : vector<8x32xf32>, vector<8x32xf32> -> vector<8x64xf32>
    %cst_47 = arith.constant dense<0.000000e+00> : vector<64xf32>
    %200 = vector.multi_reduction <add>, %199, %cst_47 [0] : vector<8x64xf32> to vector<64xf32>
    %201 = vector.shape_cast %200 : vector<64xf32> to vector<1x64xf32>
    %cst_48 = arith.constant 8.000000e+00 : f32
    %202 = vector.broadcast %cst_48 : f32 to vector<1x64xf32>
    %203 = arith.divf %201, %202 : vector<1x64xf32>
    %204 = vector.extract_strided_slice %203 {offsets = [0, 0], sizes = [1, 32], strides = [1, 1]} : vector<1x64xf32> to vector<1x32xf32>
    %205 = vector.extract_strided_slice %203 {offsets = [0, 32], sizes = [1, 32], strides = [1, 1]} : vector<1x64xf32> to vector<1x32xf32>
    %206 = arith.mulf %204, %204 : vector<1x32xf32>
    %207 = arith.subf %205, %206 : vector<1x32xf32>
    %cst_49 = arith.constant 0.000000e+00 : f32
    %208 = vector.broadcast %cst_49 : f32 to vector<1x32xf32>
    %209 = arith.maximumf %207, %208 : vector<1x32xf32>
    %210 = vector.broadcast %204 : vector<1x32xf32> to vector<8x32xf32>
    %211 = arith.subf %197, %210 : vector<8x32xf32>
    %212 = vector.broadcast %101 : vector<1x32xf32> to vector<8x32xf32>
    %213 = arith.mulf %212, %211 : vector<8x32xf32>
    %cst_50 = arith.constant 9.99999974E-6 : f32
    %214 = vector.broadcast %cst_50 : f32 to vector<1x32xf32>
    %215 = arith.addf %209, %214 : vector<1x32xf32>
    %216 = math.rsqrt %215 : vector<1x32xf32>
    %217 = vector.broadcast %216 : vector<1x32xf32> to vector<8x32xf32>
    %218 = arith.mulf %213, %217 : vector<8x32xf32>
    %219 = vector.broadcast %104 : vector<1x32xf32> to vector<8x32xf32>
    %220 = arith.addf %218, %219 : vector<8x32xf32>
    %cst_51 = arith.constant 0.000000e+00 : f32
    %221 = vector.broadcast %cst_51 : f32 to vector<8x32xf32>
    %222 = arith.maximumf %220, %221 : vector<8x32xf32>
    %c320 = arith.constant 320 : index
    %c0_52 = arith.constant 0 : index
    %223 = vector.load %arg3[%c320, %c0_52] : memref<368x128xf32, #tpu.memory_space<vmem>>, vector<32x32xf32>
    %cst_53 = arith.constant dense<0.000000e+00> : vector<8x32xf32>
    %224 = tpu.matmul %222, %223, %cst_53 {dimension_numbers = #tpu.dot_dimension_numbers<[1], [0], [0], [1], [0, 0, 1, 1], [], []>} : vector<8x32xf32>, vector<32x32xf32>, vector<8x32xf32> -> vector<8x32xf32>
    %225 = arith.mulf %224, %224 : vector<8x32xf32>
    %226 = tpu.concatenate %224, %225 in 1 : vector<8x32xf32>, vector<8x32xf32> -> vector<8x64xf32>
    %cst_54 = arith.constant dense<0.000000e+00> : vector<64xf32>
    %227 = vector.multi_reduction <add>, %226, %cst_54 [0] : vector<8x64xf32> to vector<64xf32>
    %228 = vector.shape_cast %227 : vector<64xf32> to vector<1x64xf32>
    %cst_55 = arith.constant 8.000000e+00 : f32
    %229 = vector.broadcast %cst_55 : f32 to vector<1x64xf32>
    %230 = arith.divf %228, %229 : vector<1x64xf32>
    %231 = vector.extract_strided_slice %230 {offsets = [0, 0], sizes = [1, 32], strides = [1, 1]} : vector<1x64xf32> to vector<1x32xf32>
    %232 = vector.extract_strided_slice %230 {offsets = [0, 32], sizes = [1, 32], strides = [1, 1]} : vector<1x64xf32> to vector<1x32xf32>
    %233 = arith.mulf %231, %231 : vector<1x32xf32>
    %234 = arith.subf %232, %233 : vector<1x32xf32>
    %cst_56 = arith.constant 0.000000e+00 : f32
    %235 = vector.broadcast %cst_56 : f32 to vector<1x32xf32>
    %236 = arith.maximumf %234, %235 : vector<1x32xf32>
    %237 = vector.broadcast %231 : vector<1x32xf32> to vector<8x32xf32>
    %238 = arith.subf %224, %237 : vector<8x32xf32>
    %239 = vector.broadcast %102 : vector<1x32xf32> to vector<8x32xf32>
    %240 = arith.mulf %239, %238 : vector<8x32xf32>
    %cst_57 = arith.constant 9.99999974E-6 : f32
    %241 = vector.broadcast %cst_57 : f32 to vector<1x32xf32>
    %242 = arith.addf %236, %241 : vector<1x32xf32>
    %243 = math.rsqrt %242 : vector<1x32xf32>
    %244 = vector.broadcast %243 : vector<1x32xf32> to vector<8x32xf32>
    %245 = arith.mulf %240, %244 : vector<8x32xf32>
    %246 = vector.broadcast %105 : vector<1x32xf32> to vector<8x32xf32>
    %247 = arith.addf %245, %246 : vector<8x32xf32>
    %cst_58 = arith.constant 0.000000e+00 : f32
    %248 = vector.broadcast %cst_58 : f32 to vector<8x32xf32>
    %249 = arith.maximumf %247, %248 : vector<8x32xf32>
    %250 = vector.broadcast %106 : vector<1x32xf32> to vector<8x32xf32>
    %251 = arith.addf %195, %250 : vector<8x32xf32>
    %252 = arith.mulf %166, %251 : vector<8x32xf32>
    %253 = arith.addf %252, %166 : vector<8x32xf32>
    %254 = vector.broadcast %107 : vector<1x32xf32> to vector<8x32xf32>
    %255 = arith.mulf %253, %254 : vector<8x32xf32>
    %cst_59 = arith.constant dense<0.000000e+00> : vector<8xf32>
    %256 = vector.multi_reduction <add>, %255, %cst_59 [1] : vector<8x32xf32> to vector<8xf32>
    %257 = vector.shape_cast %256 : vector<8xf32> to vector<8x1xf32>
    %258 = vector.broadcast %108 : vector<1x32xf32> to vector<8x32xf32>
    %259 = arith.mulf %249, %258 : vector<8x32xf32>
    %cst_60 = arith.constant dense<0.000000e+00> : vector<8xf32>
    %260 = vector.multi_reduction <add>, %259, %cst_60 [1] : vector<8x32xf32> to vector<8xf32>
    %261 = vector.shape_cast %260 : vector<8xf32> to vector<8x1xf32>
    %262 = arith.addf %257, %261 : vector<8x1xf32>
    %263 = vector.broadcast %109 : vector<1x1xf32> to vector<8x1xf32>
    %264 = arith.addf %262, %263 : vector<8x1xf32>
    %265 = arith.negf %264 : vector<8x1xf32>
    %266 = math.exp %265 : vector<8x1xf32>
    %cst_61 = arith.constant 1.000000e+00 : f32
    %267 = vector.broadcast %cst_61 : f32 to vector<8x1xf32>
    %268 = arith.addf %267, %266 : vector<8x1xf32>
    %269 = arith.divf %267, %268 : vector<8x1xf32>
    %c0_62 = arith.constant 0 : index
    %c0_63 = arith.constant 0 : index
    %c0_64 = arith.constant 0 : index
    %270 = vector.load %arg4[%c0_62, %c0_63, %c0_64] : memref<1x8x1xf32, #tpu.memory_space<vmem>>, vector<1x8x1xf32>
    %271 = vector.shape_cast %270 : vector<1x8x1xf32> to vector<8x1xf32>
    %272 = vector.shape_cast %269 : vector<8x1xf32> to vector<1x8x1xf32>
    tpu.vector_store %arg4[%c0_62, %c0_63, %c0_64], %272 {strides = array<i32>} : memref<1x8x1xf32, #tpu.memory_space<vmem>>, vector<1x8x1xf32>,
    return
  }
  func.func @transform_0(%arg0: i32) -> (i32, i32, i32) {
    %c0_i32 = arith.constant 0 : i32
    %c0_i32_0 = arith.constant 0 : i32
    %c0_i32_1 = arith.constant 0 : i32
    return %arg0, %c0_i32, %c0_i32_0 : i32, i32, i32
  }
  func.func @transform_1(%arg0: i32) -> (i32, i32, i32) {
    %c0_i32 = arith.constant 0 : i32
    %c0_i32_0 = arith.constant 0 : i32
    %c0_i32_1 = arith.constant 0 : i32
    return %arg0, %c0_i32, %c0_i32_0 : i32, i32, i32
  }
  func.func @transform_2(%arg0: i32) -> (i32, i32) {
    %c0_i32 = arith.constant 0 : i32
    %c0_i32_0 = arith.constant 0 : i32
    %c0_i32_1 = arith.constant 0 : i32
    return %c0_i32, %c0_i32_0 : i32, i32
  }
  func.func @transform_3(%arg0: i32) -> (i32, i32, i32) {
    %c0_i32 = arith.constant 0 : i32
    %c0_i32_0 = arith.constant 0 : i32
    %c0_i32_1 = arith.constant 0 : i32
    return %arg0, %c0_i32, %c0_i32_0 : i32, i32, i32
  }
}

</mosaic_0001>

<bundles_post_ra>
// kernel: tpu_custom_call.1
= control target key start
LH: loop header
LB: loop body
LE: loop exit
PB: predicated region body
PF: predicated region fallthrough
CT: control target
= control target key end

     0   :  { %8 = vsyncpa [#allocation3], 0  ;;  %s1495_s12 = smov 0   ;;  %s1719_s0 = inlined_call_operand.vmem [shape: s32[4,8,6], index: 0, kind: input, shape index: {}]   ;;  %s1720_s1 = inlined_call_operand.vmem [shape: f32[4,8,4], index: 1, kind: input, shape index: {}]   ;;  %s1721_s2 = inlined_call_operand.hbm [shape: f32[368,128], index: 2, kind: input, shape index: {}]   ;;  %s1722_s3 = inlined_call_operand.vmem [shape: f32[4,8,1], index: 3, kind: output, shape index: {}]  }
   0x1 LB: > { %s1501_s13 = sadd.s32 4294967295, %s1459_s12   ;;  %p1186_p0 = scmp.ge.s32.totalorder %s1459_s12, 1  ;;  %s1459_s12 = sphi %s1495_s12, %s14_s12  }
   0x2   : > { %p118_p1 = scmp.lt.s32.totalorder %s1459_s12, 5  ;;  %s1461_s14 = smov [#allocation2]  }
   0x3   : > { %s130_s15 = sshll.u32 %s1461_s14, 4  ;;  %p1372_p3 = scmp.eq.s32.totalorder %s1501_s13, 0  ;;  %s131_s15 = int_to_ptr.vmem [resolvable:$true] %s130_s15 }
   0x4   : > { %p1505_p2 = pnand %p1186_p0, %p118_p1  ;;  %s1434_s17 = scalar_lea.vmem %s131_s15, 5888 }
   0x5   : > { %p1435_p7 = scmp.ne.s32.totalorder %s131_s15, %s1434_s17  ;;  %p1442_p10 = scmp.lt.s32.totalorder %s131_s15, %s131_s15 }
   0x6   : > { %p1368_p4 = pneg %p1505_p2  ;;  %p1443_p11 = scmp.lt.s32.totalorder %s1434_s17, %s1434_s17 }
   0x8   : > { %p1369_p5 = pnand %p1372_p3, %p1368_p4  ;;  %p1444_p12 = por %p1443_p11, %p1442_p10 }
   0xa   : > { %p1425_p6 = pneg %p1369_p5 }
   0xc   : > { %p1437_p8 = pnand %p1435_p7, %p1425_p6 }
   0xe   : > { %p1438_p9 = pneg %p1437_p8 }
  0x10   : > { %p1445_p13 = pnand %p1444_p12, %p1438_p9 }
  0x12   : > { %1448 = shalt.err (!%p1445_p13)
}
  0x13   : > { %s1462_s18 = smov 128   ;;  %s1463_s19 = smov 8  }
  0x14   : > { %1371 = dma.hbm_to_vmem [thread:$0]  (!%p1369_p5), %s1721_s2, 5888, %s131_s15, [#allocation3], %s1462_s18, %s1462_s18, %s1463_s19  }
  0x15   : > { %160 = sbr.rel (%p1505_p2) target bundleno = 3332 (0xd04), region = 32 }
  0x1a   : > { %1454 = dma.done.wait (%p1372_p3), [#allocation3], 5888  }
  0x1b   : > { %1456 = vsyncadd (%p1372_p3), [#allocation3], 4294961408  ;;  %p186_p0 = scmp.lt.s32.totalorder %s1501_s13, 3  ;;  %v1464_v0 = vmov 0   ;;  %v1465_v1 = vmov 2   ;;  %v1466_v2 = vmov 0.0   ;;  %v200_v33 = vlaneseq }
  0x1c   : > { %1396 = vset.pattern.permute.xlu0 %v1464_v0  ;;  %1398 = vset.pattern.permute.xlu1 %v1465_v1  ;;  %v287_v4 = vld [vmem:[#allocation2 + $0x78] sm:$0xff]  ;;  %v286_v6 = vld [vmem:[#allocation2 + $0x70] sm:$0xff]  ;;  %v285_v8 = vld [vmem:[#allocation2 + $0x68] sm:$0xff]  ;;  %v1467_v11 = vmov 1   ;;  %v1468_v13 = vmov 3   ;;  %v1469_v17 = vmov 5  }
  0x1d   : > { %s1725_s13 = smov (!%p186_p0, %s1501_s13), 3  ;;  %1255 = vmatprep.subr.mxu0 %v1466_v2  ;;  %1290 = vmatprep.subr.mxu1 %v1466_v2  ;;  %v284_v10 = vld [vmem:[#allocation2 + $0x60] sm:$0xff]  ;;  %v283_v12 = vld [vmem:[#allocation2 + $0x58] sm:$0xff]  ;;  %v282_v15 = vld [vmem:[#allocation2 + $0x50] sm:$0xff]  ;;  %v1470_v19 = vmov 4   ;;  %vm1471_vm0 = vmmov 0  }
  0x1e   : > { %s1527_s22 = sshll.u32 %s1725_s13, 3  ;;  %1256 = vmatpush3.msra.mxu0 %v287_v4  ;;  %v281_v18 = vld [vmem:[#allocation2 + $0x48] sm:$0xff]  ;;  %v280_v20 = vld [vmem:[#allocation2 + $0x40] sm:$0xff]  ;;  %v279_v21 = vld [vmem:[#allocation2 + $0x38] sm:$0xff]  ;;  %1287 = vmatprep.mubr.msk.f32.mxu0 %vm1471_vm0, %v1466_v2  ;;  %v201_v34 = vand.u32 127, %v200_v33  ;;  %vm364_vm11 = vcmask 261120  }
  0x1f   : > { %s189_s25 = scalar_lea.vmem %s1719_s0, %s1527_s22  ;;  %1257 = vmatprep.subr.mxu0 %v1466_v2  ;;  %s193_s28 = scalar_lea.vmem %s1720_s1, %s1527_s22  ;;  %v278_v23 = vld [vmem:[#allocation2 + $0x30] sm:$0xff]  ;;  %v277_v24 = vld [vmem:[#allocation2 + $0x28] sm:$0xff]  ;;  %v276_v25 = vld [vmem:[#allocation2 + $0x20] sm:$0xff]  ;;  %1298 = vmatprep.mubr.msk.f32.mxu1 %vm1471_vm0, %v1466_v2  ;;  %vm537_vm12 = vcmask 523264   ;;  %vm1105_vm13 = vcmask 7168  }
  0x20   : > { %v198_v3 = vld [vmem:[%s189_s25] sm:$0xff]  ;;  %1258 = vmatpush3.msra.mxu0 %v286_v6  ;;  %v275_v26 = vld [vmem:[#allocation2 + $0x18] sm:$0xff]  ;;  %v274_v27 = vld [vmem:[#allocation2 + $0x10] sm:$0xff]  ;;  %vm243_vm7 = vcmp.eq.s32.totalorder %v201_v34, 65  ;;  %vm251_vm8 = vcmp.eq.s32.totalorder %v201_v34, 66  ;;  %vm258_vm9 = vcmp.eq.s32.totalorder %v201_v34, 67  ;;  %s197_s7 = scalar_lea.vmem %s1722_s3, %s1527_s22 }
  0x21   : > { %203 = vperm.xlu0 %1396, %v198_v3   ;;  %v215_v5 = vadd.s32 22, %v198_v3  ;;  %v208_v7 = vadd.s32 10, %v198_v3  ;;  %v222_v9 = vadd.s32 30, %v198_v3  ;;  %1259 = vmatprep.subr.mxu0 %v1466_v2  ;;  %v236_v14 = vadd.s32 54, %v198_v3  ;;  %v199_v22 = vld [vmem:[%s193_s28] sm:$0xff]  ;;  %v273_v28 = vld [vmem:[#allocation2 + $0x8] sm:$0xff] }
  0x22   : > { %1260 = vmatpush3.msra.mxu0 %v285_v8  ;;  %v229_v16 = vadd.s32 45, %v198_v3  ;;  %v363_v29 = vld [vmem:[#allocation2 + $0x98] sm:$0xff]  ;;  %v272_v30 = vld [vmem:[#allocation2] sm:$0xff]  ;;  %v362_v31 = vld [vmem:[#allocation2 + $0x90] sm:$0xff]  ;;  %vm265_vm10 = vcmp.eq.s32.totalorder %v201_v34, 68  ;;  %v1579_v8 = vshrl.u32 %v200_v33, 7 }
  0x23   : > { %217 = vperm.xlu1 %1398, %v215_v5   ;;  %1261 = vmatprep.subr.mxu0 %v1466_v2  ;;  %v361_v32 = vld [vmem:[#allocation2 + $0x88] sm:$0xff]  ;;  %v448_v4 = vld [vmem:[#allocation2 + $0xb8] sm:$0xff]  ;;  %v447_v5 = vld [vmem:[#allocation2 + $0xb0] sm:$0xff]  ;;  %s1472_s29 = smov 96   ;;  %s1473_s30 = smov 32  }
  0x24   : > { %1262 = vmatpush3.msra.mxu0 %v284_v10  ;;  %1291 = vmatpush3.msra.mxu1 %v363_v29  ;;  %v446_v6 = vld [vmem:[#allocation2 + $0xa8] sm:$0xff]  ;;  %v1584_v10 = vld [vmem:[#allocation2 + $0x160] sm:$0xff]  ;;  %s1474_s4 = smov 64   ;;  %v592_v33 = vld [vmem:[#allocation2 + $0xf8] sm:$0xff] }
  0x25   : > { %1397 = vset.pattern.permute.xlu0 %v1467_v11  ;;  %1263 = vmatprep.subr.mxu0 %v1466_v2 }
  0x26   : > { %210 = vperm.xlu0 %1397, %v208_v7   ;;  %1264 = vmatpush3.msra.mxu0 %v283_v12  ;;  %v445_v7 = vld [vmem:[#allocation2 + $0xa0] sm:$0xff] }
  0x27   : > { %1399 = vset.pattern.permute.xlu1 %v1468_v13  ;;  %1265 = vmatprep.subr.mxu0 %v1466_v2 }
  0x28   : > { %224 = vperm.xlu1 %1399, %v222_v9   ;;  %1266 = vmatpush3.msra.mxu0 %v282_v15  ;;  %v1582_v9 = vsub.s32 0, %v1579_v8 }
  0x29   : > { %1267 = vmatprep.subr.mxu0 %v1466_v2  ;;  %1292 = vmatprep.subr.mxu1 %v1466_v2 }
  0x2a   : > { %1401 = vset.pattern.permute.xlu0 %v1469_v17  ;;  %1268 = vmatpush3.msra.mxu0 %v281_v18 }
  0x2b   : > { %238 = vperm.xlu0 %1401, %v236_v14   ;;  %1269 = vmatprep.subr.mxu0 %v1466_v2 }
  0x2c   : > { %1400 = vset.pattern.permute.xlu1 %v1470_v19  ;;  %1270 = vmatpush3.msra.mxu0 %v280_v20 }
  0x2d   : > { %231 = vperm.xlu1 %1400, %v229_v16   ;;  %1271 = vmatprep.subr.mxu0 %v1466_v2 }
  0x2e   : > { %1272 = vmatpush3.msra.mxu0 %v279_v21  ;;  %1293 = vmatpush3.msra.mxu1 %v362_v31  ;;  %v451_v31 = vsub.s32 1, %v1579_v8 }
  0x2f   : > { %1404 = vset.pattern.permute.xlu0 %v1465_v1  ;;  %1273 = vmatprep.subr.mxu0 %v1466_v2 }
  0x30   : > { %260 = vperm.xlu0 %1404, %v199_v22   ;;  %1274 = vmatpush3.msra.mxu0 %v278_v23 }
  0x31   : > { %1402 = vset.pattern.permute.xlu1 %v1464_v0  ;;  %1275 = vmatprep.subr.mxu0 %v1466_v2  ;;  %v360_v0 = vld [vmem:[#allocation2 + $0x80] sm:$0xff] }
  0x32   : > { %246 = vperm.xlu1 %1402, %v199_v22   ;;  %1276 = vmatpush3.msra.mxu0 %v277_v24 }
  0x33   : > { %1277 = vmatprep.subr.mxu0 %v1466_v2  ;;  %1294 = vmatprep.subr.mxu1 %v1466_v2 }
  0x34   : > { %1406 = vset.pattern.permute.xlu0 %v1468_v13  ;;  %1278 = vmatpush3.msra.mxu0 %v276_v25 }
  0x35   : > { %1279 = vmatprep.subr.mxu0 %v1466_v2  ;;  %1295 = vmatpush3.msra.mxu1 %v361_v32  ;;  %v452_v32 = vrot.slane %v1584_v10, %v451_v31 }
  0x36   : > { %1403 = vset.pattern.permute.xlu1 %v1467_v11  ;;  %1280 = vmatpush3.msra.mxu0 %v275_v26  ;;  %v441_v11 = vrot.slane %v1584_v10, %v1582_v9 }
  0x37   : > { %253 = vperm.xlu1 %1403, %v199_v22   ;;  %1281 = vmatprep.subr.mxu0 %v1466_v2 }
  0x38   : > { %1282 = vmatpush3.msra.mxu0 %v274_v27  ;;  %1296 = vmatprep.subr.mxu1 %v1466_v2 }
  0x39   : > { %1283 = vmatprep.subr.mxu0 %v1466_v2  ;;  %1297 = vmatpush3.msra.mxu1 %v360_v0  ;;  %v695_v0 = vld [vmem:[#allocation2 + $0x110] sm:$0xff] }
  0x3a   : > { %1284 = vmatpush3.msra.mxu0 %v273_v28  ;;  %1301 = vmatprep.subr.mxu1 %v1466_v2 }
  0x3b   : > { %1405 = vset.pattern.permute.xlu1 %v1468_v13  ;;  %1285 = vmatprep.subr.mxu0 %v1466_v2 }
  0x3c   : > { %267 = vperm.xlu1 %1405, %v199_v22   ;;  %1286 = vmatpush3.msra.mxu0 %v272_v30 }
  0x3d   : > { %1331 = vmatprep.subr.mxu0 %v1466_v2 }
  0x9c   : > { %v204_v35 = vpop.permute.xlu0 %203 }
  0x9d   : > { %vm205_vm1 = vcmp.eq.s32.totalorder %v201_v34, %v204_v35  ;;  %v590_v35 = vld [vmem:[#allocation2 + $0xe8] sm:$0xff] }
  0x9e   : > { %v218_v36 = vpop.permute.xlu1 %217  ;;  %v206_v37 = vsel %vm205_vm1, 1.0, %v1466_v2 }
  0x9f   : > { %vm219_vm2 = vcmp.eq.s32.totalorder %v201_v34, %v218_v36 }
  0xa0   : > { %v220_v42 = vsel %vm219_vm2, 1.0, %v1466_v2 }
  0xa1   : > { %v211_v38 = vpop.permute.xlu0 %210 }
  0xa2   : > { %vm212_vm3 = vcmp.eq.s32.totalorder %v201_v34, %v211_v38 }
  0xa3   : > { %v213_v39 = vsel %vm212_vm3, 1.0, %v1466_v2  ;;  %v225_v40 = vpop.permute.xlu1 %224 }
  0xa4   : > { %v214_v41 = vadd.f32 %v213_v39, %v206_v37  ;;  %vm226_vm4 = vcmp.eq.s32.totalorder %v201_v34, %v225_v40  ;;  %v589_v37 = vld [vmem:[#allocation2 + $0xe0] sm:$0xff] }
  0xa5   : > { %v227_v45 = vsel %vm226_vm4, 1.0, %v1466_v2 }
  0xa6   : > { %v221_v43 = vadd.f32 %v220_v42, %v214_v41  ;;  %v239_v44 = vpop.permute.xlu0 %238 }
  0xa7   : > { %vm240_vm5 = vcmp.eq.s32.totalorder %v201_v34, %v239_v44 }
  0xa8   : > { %v228_v46 = vadd.f32 %v227_v45, %v221_v43  ;;  %v232_v47 = vpop.permute.xlu1 %231  ;;  %v241_v50 = vsel %vm240_vm5, 1.0, %v1466_v2 }
  0xa9   : > { %vm233_vm6 = vcmp.eq.s32.totalorder %v201_v34, %v232_v47  ;;  %v591_v34 = vld [vmem:[#allocation2 + $0xf0] sm:$0xff] }
  0xaa   : > { %v234_v48 = vsel %vm233_vm6, 1.0, %v1466_v2  ;;  %v587_v47 = vld [vmem:[#allocation2 + $0xd0] sm:$0xff] }
  0xab   : > { %v235_v49 = vadd.f32 %v234_v48, %v228_v46  ;;  %v261_v54 = vpop.permute.xlu0 %260  ;;  %v588_v46 = vld [vmem:[#allocation2 + $0xd8] sm:$0xff]  ;;  %v586_v48 = vld [vmem:[#allocation2 + $0xc8] sm:$0xff] }
  0xac   : > { %v263_v58 = vsel %vm258_vm9, %v261_v54, 0.0  ;;  %v581_v54 = vsub.s32 3, %v1579_v8 }
  0xad   : > { %v247_v51 = vpop.permute.xlu1 %246  ;;  %v242_v52 = vadd.f32 %v241_v50, %v235_v49  ;;  %v585_v49 = vld [vmem:[#allocation2 + $0xc0] sm:$0xff] }
  0xae   : > { %v249_v53 = vsel %vm243_vm7, %v247_v51, 0.0 }
  0xaf   : > { %v250_v55 = vadd.f32 %v249_v53, %v242_v52  ;;  %v561_v52 = vsub.s32 2, %v1579_v8 }
  0xb1   : > { %v562_v53 = vrot.slane %v1584_v10, %v561_v52 }
  0xb2   : > { %v254_v56 = vpop.permute.xlu1 %253 }
  0xb3   : > { %v256_v57 = vsel %vm251_vm8, %v254_v56, 0.0 }
  0xb4   : > { %v257_v59 = vadd.f32 %v256_v57, %v250_v55  ;;  %v582_v57 = vrot.slane %v1584_v10, %v581_v54 }
  0xb6   : > { %v264_v60 = vadd.f32 %v263_v58, %v257_v59 }
  0xb7   : > { %v268_v61 = vpop.permute.xlu1 %267 }
  0xb8   : > { %v270_v62 = vsel %vm265_vm10, %v268_v61, 0.0 }
  0xb9   : > { %v271_v63 = vadd.f32 %v270_v62, %v264_v60  ;;  %v595_v62 = vsub.s32 4, %v1579_v8 }
  0xbb   : > { %1288 = vmatmul.mubr.f32.vlgmr.msra.gmra.mxu0 %v271_v63  ;;  %v696_v63 = vld [vmem:[#allocation2 + $0x118] sm:$0xff] }
  0xbc   : > { %1339 = vmatprep.mubr.msk.f32.mxu0 %vm1471_vm0, %v1466_v2  ;;  %1332 = vmatpush3.msra.mxu0 %v696_v63 }
  0xbd   : > { %1333 = vmatprep.subr.mxu0 %v1466_v2 }
  0xbe   : > { %1334 = vmatpush3.msra.mxu0 %v695_v0 }
  0xbf   : > { %1335 = vmatprep.subr.mxu0 %v1466_v2 }
 0x17b   : > { %v1569_v1 = vpop.f32.mrf.mxu0 }
 0x17c   : > { %1299 = vmatmul.mubr.msk.f32.vlgmr.msra.gmra.mxu1 %vm364_vm11, %v1569_v1 }
 0x17d   : > { %v1289_v3 = vpop.f32.mrf.mxu0  ;;  %1309 = vmatprep.mubr.msk.f32.mxu1 %vm1471_vm0, %v1466_v2  ;;  %1302 = vmatpush3.msra.mxu1 %v448_v4 }
 0x17e   : > { %1303 = vmatprep.subr.mxu1 %v1466_v2  ;;  %v694_v3 = vld [vmem:[#allocation2 + $0x108] sm:$0xff] }
 0x17f   : > { %1304 = vmatpush3.msra.mxu1 %v447_v5  ;;  %v693_v5 = vld [vmem:[#allocation2 + $0x100] sm:$0xff]  ;;  %1336 = vmatpush3.msra.mxu0 %v694_v3 }
 0x180   : > { %1305 = vmatprep.subr.mxu1 %v1466_v2  ;;  %1337 = vmatprep.subr.mxu0 %v1466_v2 }
 0x181   : > { %1306 = vmatpush3.msra.mxu1 %v446_v6  ;;  %1338 = vmatpush3.msra.mxu0 %v693_v5 }
 0x182   : > { %1307 = vmatprep.subr.mxu1 %v1466_v2  ;;  %1353 = vmatprep.subr.mxu0 %v1466_v2 }
 0x183   : > { %1308 = vmatpush3.msra.mxu1 %v445_v7 }
 0x184   : > { %1312 = vmatprep.subr.mxu1 %v1466_v2 }
 0x23c   : > { %v434_v12 = vpop.f32.mrf.mxu1 }
 0x23d   : > { %v442_v13 = vadd.f32 %v441_v11, %v434_v12  ;;  %530 = vrot.lane.b32.xlu1 %v434_v12, %s1472_s29  ;;  %v528_v14 = vmul.f32 %v434_v12, %v434_v12 }
 0x23e   : > { %v1300_v15 = vpop.f32.mrf.mxu1 }
 0x23f   : > { %v443_v16 = vmul.f32 %v442_v13, %v1569_v1  ;;  %534 = vrot.lane.b32.xlu0 %v528_v14, %s1473_s30 }
 0x241   : > { %v444_v17 = vadd.f32 %v443_v16, %v1569_v1 }
 0x243   : > { %1310 = vmatmul.mubr.msk.f32.vlgmr.msra.gmra.mxu1 %vm364_vm11, %v444_v17 }
 0x244   : > { %1328 = vmatprep.mubr.msk.f32.mxu1 %vm1471_vm0, %v1466_v2  ;;  %1313 = vmatpush3.msra.mxu1 %v592_v33 }
 0x245   : > { %1314 = vmatprep.subr.mxu1 %v1466_v2 }
 0x246   : > { %1315 = vmatpush3.msra.mxu1 %v591_v34 }
 0x247   : > { %1316 = vmatprep.subr.mxu1 %v1466_v2 }
 0x248   : > { %1317 = vmatpush3.msra.mxu1 %v590_v35 }
 0x249   : > { %1318 = vmatprep.subr.mxu1 %v1466_v2 }
 0x24a   : > { %1319 = vmatpush3.msra.mxu1 %v589_v37 }
 0x24b   : > { %1320 = vmatprep.subr.mxu1 %v1466_v2 }
 0x24c   : > { %1321 = vmatpush3.msra.mxu1 %v588_v46  ;;  %v817_v46 = vld [vmem:[#allocation2 + $0x128] sm:$0xff] }
 0x24d   : > { %1322 = vmatprep.subr.mxu1 %v1466_v2 }
 0x24e   : > { %1323 = vmatpush3.msra.mxu1 %v587_v47  ;;  %v816_v47 = vld [vmem:[#allocation2 + $0x120] sm:$0xff] }
 0x24f   : > { %1324 = vmatprep.subr.mxu1 %v1466_v2 }
 0x250   : > { %1325 = vmatpush3.msra.mxu1 %v586_v48 }
 0x251   : > { %1326 = vmatprep.subr.mxu1 %v1466_v2 }
 0x252   : > { %1327 = vmatpush3.msra.mxu1 %v585_v49 }
 0x253   : > { %1342 = vmatprep.subr.mxu1 %v1466_v2 }
 0x2af   : > { %v531_v18 = vpop.permute.xlu1 %530 }
 0x2b1   : > { %v535_v19 = vpop.permute.xlu0 %534 }
 0x2b2   : > { %v538_v20 = vsel %vm537_vm12, %v531_v18, %v535_v19 }
 0x2b3   : > { %v539_v21 = vrot.slane %v538_v20, 4 }
 0x2b5   : > { %v540_v22 = vadd.f32 %v539_v21, %v538_v20 }
 0x2b7   : > { %v541_v23 = vrot.slane %v540_v22, 2 }
 0x2b9   : > { %v542_v24 = vadd.f32 %v541_v23, %v540_v22 }
 0x2bb   : > { %v543_v25 = vrot.slane %v542_v24, 1 }
 0x2bd   : > { %v544_v26 = vadd.f32 %v543_v25, %v542_v24 }
 0x2bf   : > { %v546_v27 = vmul.f32 0.125, %v544_v26 }
 0x2c1   : > { %555 = vrot.lane.b32.xlu0 %v546_v27, %s1473_s30  ;;  %v547_v28 = vmul.f32 %v546_v27, %v546_v27 }
 0x2c3   : > { %549 = vrot.lane.b32.xlu1 %v547_v28, %s1474_s4 }
 0x303   : > { %v522_v29 = vpop.f32.mrf.mxu1 }
 0x304   : > { %v523_v36 = vadd.f32 %v522_v29, %v452_v32 }
 0x305   : > { %v1311_v30 = vpop.f32.mrf.mxu1 }
 0x306   : > { %v526_v39 = vmul.f32 %v523_v36, %v1569_v1 }
 0x308   : > { %v527_v44 = vadd.f32 %v526_v39, %v444_v17 }
 0x333   : > { %v556_v38 = vpop.permute.xlu0 %555 }
 0x334   : > { %v558_v40 = vsub.f32 %v434_v12, %v556_v38 }
 0x335   : > { %v550_v41 = vpop.permute.xlu1 %549 }
 0x336   : > { %v552_v42 = vsub.f32 %v546_v27, %v550_v41  ;;  %564 = vrot.lane.b32.xlu1 %v558_v40, %s1472_s29  ;;  %v819_v40 = vld [vmem:[#allocation2 + $0x138] sm:$0xff] }
 0x338   : > { %v553_v43 = vmax.f32 %v552_v42, 0.0 }
 0x33a   : > { %v568_v45 = vadd.f32 1e-05, %v553_v43  ;;  %672 = vrot.lane.b32.xlu1 %v527_v44, %s1473_s30 }
 0x33c   : > { %1407 = vrsqrt.f32 %v568_v45  ;;  %v818_v45 = vld [vmem:[#allocation2 + $0x130] sm:$0xff] }
 0x349   : > { %v1408_v50 = vpop.eup %1407 }
 0x34a   : > { %v573_v51 = vrot.slane %v1408_v50, %v1582_v9  ;;  %v796_v50 = vsub.s32 5, %v1579_v8 }
 0x34c   : > { %575 = vrot.lane.b32.xlu0 %v573_v51, %s1474_s4 }
 0x350   : > { %682 = vrot.lane.b32.xlu0 %v1569_v1, %s1473_s30  ;;  %v596_v1 = vrot.slane %v1584_v10, %v595_v62 }
 0x3a8   : > { %v565_v55 = vpop.permute.xlu1 %564 }
 0x3a9   : > { %v567_v56 = vmul.f32 %v565_v55, %v562_v53  ;;  %v797_v53 = vrot.slane %v1584_v10, %v796_v50  ;;  %v1663_v55 = vld [vmem:[#allocation2 + $0x168] sm:$0xff] }
 0x3ac   : > { %v673_v12 = vpop.permute.xlu1 %672 }
 0x3be   : > { %v576_v58 = vpop.permute.xlu0 %575 }
 0x3bf   : > { %v578_v59 = vmul.f32 %v576_v58, %v567_v56 }
 0x3c1   : > { %v583_v60 = vadd.f32 %v582_v57, %v578_v59  ;;  %v813_v57 = vrot.slane %v1663_v55, %v1582_v9 }
 0x3c2   : > { %v683_v19 = vpop.permute.xlu0 %682 }
 0x3c3   : > { %v584_v61 = vmax.f32 %v583_v60, 0.0 }
 0x3c5   : > { %1329 = vmatmul.mubr.msk.f32.vlgmr.msra.gmra.mxu1 %vm537_vm12, %v584_v61 }
 0x3c6   : > { %1350 = vmatprep.mubr.msk.f32.mxu1 %vm1471_vm0, %v1466_v2  ;;  %1343 = vmatpush3.msra.mxu1 %v819_v40 }
 0x3c7   : > { %1344 = vmatprep.subr.mxu1 %v1466_v2 }
 0x3c8   : > { %1345 = vmatpush3.msra.mxu1 %v818_v45 }
 0x3c9   : > { %1346 = vmatprep.subr.mxu1 %v1466_v2 }
 0x3ca   : > { %1347 = vmatpush3.msra.mxu1 %v817_v46 }
 0x3cb   : > { %1348 = vmatprep.subr.mxu1 %v1466_v2 }
 0x3cc   : > { %1349 = vmatpush3.msra.mxu1 %v816_v47 }
 0x485   : > { %v666_v4 = vpop.f32.mrf.mxu1 }
 0x486   : > { %v667_v6 = vadd.f32 %v666_v4, %v596_v1 }
 0x487   : > { %v1330_v7 = vpop.f32.mrf.mxu1 }
 0x488   : > { %v670_v11 = vmul.f32 %v667_v6, %v527_v44  ;;  %v675_v13 = vmul.f32 %v673_v12, %v667_v6 }
 0x48a   : > { %688 = vrot.lane.b32.xlu1 %v670_v11, %s1473_s30  ;;  %v1197_v14 = vmul.f32 -1.442695, %v675_v13 }
 0x48c   : > { %1409 = vpow2.f32 %v1197_v14 }
 0x499   : > { %v1410_v15 = vpop.eup %1409 }
 0x49a   : > { %v679_v16 = vadd.f32 1.0, %v1410_v15 }
 0x49c   : > { %1411 = vrcp.f32 %v679_v16 }
 0x4a9   : > { %v1412_v17 = vpop.eup %1411 }
 0x4aa   : > { %v686_v18 = vsub.f32 1.0, %v1412_v17  ;;  %v685_v21 = vmul.f32 %v1412_v17, %v683_v19  ;;  %v940_v17 = vld [vmem:[#allocation2 + $0x158] sm:$0xff] }
 0x4fc   : > { %v689_v20 = vpop.permute.xlu1 %688 }
 0x4fd   : > { %v691_v22 = vmul.f32 %v689_v20, %v686_v18 }
 0x4ff   : > { %v1637_v23 = vadd.f32 %v691_v22, %v685_v21  ;;  %v939_v22 = vld [vmem:[#allocation2 + $0x150] sm:$0xff] }
 0x501   : > { %698 = vrot.lane.b32.xlu0 %v1637_v23, %s1472_s29 }
 0x573   : > { %v699_v24 = vpop.permute.xlu0 %698 }
 0x574   : > { %1340 = vmatmul.mubr.msk.f32.vlgmr.msra.gmra.mxu0 %vm364_vm11, %v699_v24  ;;  %v938_v24 = vld [vmem:[#allocation2 + $0x148] sm:$0xff] }
 0x575   : > { %1361 = vmatprep.mubr.msk.f32.mxu0 %vm1471_vm0, %v1466_v2  ;;  %1354 = vmatpush3.msra.mxu0 %v940_v17 }
 0x576   : > { %1355 = vmatprep.subr.mxu0 %v1466_v2 }
 0x577   : > { %1356 = vmatpush3.msra.mxu0 %v939_v22 }
 0x578   : > { %1357 = vmatprep.subr.mxu0 %v1466_v2 }
 0x579   : > { %1358 = vmatpush3.msra.mxu0 %v938_v24 }
 0x57a   : > { %1359 = vmatprep.subr.mxu0 %v1466_v2 }
 0x634   : > { %v1644_v25 = vpop.f32.mrf.mxu0 }
 0x635   : > { %v772_v26 = vmul.f32 %v1644_v25, %v1644_v25 }
 0x636   : > { %v1341_v27 = vpop.f32.mrf.mxu0 }
 0x637   : > { %774 = vrot.lane.b32.xlu1 %v772_v26, %s1473_s30  ;;  %v937_v26 = vld [vmem:[#allocation2 + $0x140] sm:$0xff] }
 0x638   : > { %1360 = vmatpush3.msra.mxu0 %v937_v26 }
 0x6a9   : > { %v775_v28 = vpop.permute.xlu1 %774 }
 0x6aa   : > { %v777_v29 = vsel %vm364_vm11, %v1644_v25, %v775_v28 }
 0x6ab   : > { %v778_v30 = vsel %vm537_vm12, %v777_v29, 0.0  ;;  %v917_v29 = vsub.s32 6, %v1579_v8 }
 0x6ac   : > { %v779_v32 = vrot.slane %v778_v30, 4 }
 0x6ae   : > { %v780_v33 = vadd.f32 %v779_v32, %v778_v30  ;;  %v918_v32 = vrot.slane %v1584_v10, %v917_v29 }
 0x6b0   : > { %v781_v34 = vrot.slane %v780_v33, 2 }
 0x6b2   : > { %v782_v35 = vadd.f32 %v781_v34, %v780_v33  ;;  %v934_v34 = vrot.slane %v1663_v55, %v451_v31 }
 0x6b4   : > { %v783_v36 = vrot.slane %v782_v35, 1 }
 0x6b6   : > { %v784_v37 = vadd.f32 %v783_v36, %v782_v35 }
 0x6b8   : > { %v785_v38 = vmul.f32 0.125, %v784_v37 }
 0x6ba   : > { %v786_v39 = vmul.f32 %v785_v38, %v785_v38  ;;  %v793_v51 = vsub.f32 %v1644_v25, %v785_v38 }
 0x6bc   : > { %788 = vrot.lane.b32.xlu0 %v786_v39, %s1473_s30  ;;  %v798_v56 = vmul.f32 %v797_v53, %v793_v51 }
 0x72e   : > { %v789_v41 = vpop.permute.xlu0 %788 }
 0x72f   : > { %v791_v42 = vsub.f32 %v785_v38, %v789_v41  ;;  %v1061_v41 = vrot.slane %v1663_v55, %v581_v54  ;;  %v1072_v54 = vrot.slane %v1663_v55, %v595_v62 }
 0x731   : > { %v792_v43 = vmax.f32 %v791_v42, 0.0 }
 0x733   : > { %v799_v44 = vadd.f32 1e-05, %v792_v43 }
 0x735   : > { %1413 = vrsqrt.f32 %v799_v44 }
 0x742   : > { %v1414_v48 = vpop.eup %1413 }
 0x743   : > { %v804_v49 = vrot.slane %v1414_v48, %v1582_v9 }
 0x745   : > { %806 = vrot.lane.b32.xlu1 %v804_v49, %s1472_s29 }
 0x7b7   : > { %v807_v58 = vpop.permute.xlu1 %806 }
 0x7b8   : > { %v809_v59 = vmul.f32 %v807_v58, %v798_v56 }
 0x7ba   : > { %v814_v60 = vadd.f32 %v813_v57, %v809_v59 }
 0x7bc   : > { %v815_v61 = vmax.f32 %v814_v60, 0.0 }
 0x7be   : > { %1351 = vmatmul.mubr.msk.f32.vlgmr.msra.gmra.mxu1 %vm364_vm11, %v815_v61 }
 0x87e   : > { %v889_v63 = vpop.f32.mrf.mxu1 }
 0x87f   : > { %v893_v0 = vmul.f32 %v889_v63, %v889_v63 }
 0x880   : > { %v1352_v1 = vpop.f32.mrf.mxu1 }
 0x881   : > { %895 = vrot.lane.b32.xlu0 %v893_v0, %s1473_s30 }
 0x8f3   : > { %v896_v3 = vpop.permute.xlu0 %895 }
 0x8f4   : > { %v898_v4 = vsel %vm364_vm11, %v889_v63, %v896_v3 }
 0x8f5   : > { %v899_v5 = vsel %vm537_vm12, %v898_v4, 0.0 }
 0x8f6   : > { %v900_v6 = vrot.slane %v899_v5, 4 }
 0x8f8   : > { %v901_v7 = vadd.f32 %v900_v6, %v899_v5  ;;  %v1038_v6 = vsub.s32 7, %v1579_v8 }
 0x8fa   : > { %v902_v11 = vrot.slane %v901_v7, 2 }
 0x8fc   : > { %v903_v12 = vadd.f32 %v902_v11, %v901_v7 }
 0x8fe   : > { %v904_v13 = vrot.slane %v903_v12, 1 }
 0x900   : > { %v905_v14 = vadd.f32 %v904_v13, %v903_v12  ;;  %v1055_v12 = vrot.slane %v1663_v55, %v561_v52 }
 0x902   : > { %v906_v15 = vmul.f32 0.125, %v905_v14 }
 0x904   : > { %v907_v16 = vmul.f32 %v906_v15, %v906_v15  ;;  %v914_v30 = vsub.f32 %v889_v63, %v906_v15 }
 0x906   : > { %909 = vrot.lane.b32.xlu1 %v907_v16, %s1473_s30  ;;  %v919_v33 = vmul.f32 %v918_v32, %v914_v30 }
 0x978   : > { %v910_v18 = vpop.permute.xlu1 %909 }
 0x979   : > { %v912_v19 = vsub.f32 %v906_v15, %v910_v18 }
 0x97b   : > { %v913_v20 = vmax.f32 %v912_v19, 0.0 }
 0x97d   : > { %v920_v21 = vadd.f32 1e-05, %v913_v20 }
 0x97f   : > { %1415 = vrsqrt.f32 %v920_v21 }
 0x98c   : > { %v1416_v27 = vpop.eup %1415 }
 0x98d   : > { %v925_v28 = vrot.slane %v1416_v27, %v1582_v9 }
 0x98f   : > { %927 = vrot.lane.b32.xlu0 %v925_v28, %s1472_s29 }
 0xa01   : > { %v928_v35 = vpop.permute.xlu0 %927 }
 0xa02   : > { %v930_v36 = vmul.f32 %v928_v35, %v919_v33 }
 0xa04   : > { %v935_v2 = vadd.f32 %v934_v34, %v930_v36 }
 0xa06   : > { %v936_v37 = vmax.f32 %v935_v2, 0.0 }
 0xa08   : > { %1362 = vmatmul.mubr.msk.f32.vlgmr.msra.gmra.mxu0 %vm364_vm11, %v936_v37 }
 0xac8   : > { %v1010_v38 = vpop.f32.mrf.mxu0 }
 0xac9   : > { %v1014_v39 = vmul.f32 %v1010_v38, %v1010_v38 }
 0xaca   : > { %v1363_v40 = vpop.f32.mrf.mxu0 }
 0xacb   : > { %1016 = vrot.lane.b32.xlu1 %v1014_v39, %s1473_s30 }
 0xacf   : > { %1063 = vrot.lane.b32.xlu1 %v1061_v41, %s1473_s30 }
 0xb3d   : > { %v1017_v42 = vpop.permute.xlu1 %1016 }
 0xb3e   : > { %v1019_v31 = vsel %vm364_vm11, %v1010_v38, %v1017_v42 }
 0xb3f   : > { %v1020_v43 = vsel %vm537_vm12, %v1019_v31, 0.0 }
 0xb40   : > { %v1021_v44 = vrot.slane %v1020_v43, 4 }
 0xb41   : > { %v1064_v56 = vpop.permute.xlu1 %1063 }
 0xb42   : > { %v1022_v45 = vadd.f32 %v1021_v44, %v1020_v43  ;;  %v1066_v57 = vadd.f32 %v1064_v56, %v1644_v25 }
 0xb44   : > { %v1023_v46 = vrot.slane %v1022_v45, 2  ;;  %v1067_v58 = vmul.f32 %v1066_v57, %v1637_v23 }
 0xb46   : > { %v1024_v47 = vadd.f32 %v1023_v46, %v1022_v45  ;;  %v1068_v63 = vadd.f32 %v1067_v58, %v1637_v23  ;;  %v1039_v23 = vrot.slane %v1584_v10, %v1038_v6  ;;  %v1097_v10 = vrot.slane %v1663_v55, %v917_v29 }
 0xb48   : > { %v1025_v48 = vrot.slane %v1024_v47, 1 }
 0xb4a   : > { %v1026_v49 = vadd.f32 %v1025_v48, %v1024_v47 }
 0xb4c   : > { %v1027_v51 = vmul.f32 0.125, %v1026_v49 }
 0xb4e   : > { %v1028_v53 = vmul.f32 %v1027_v51, %v1027_v51  ;;  %v1035_v7 = vsub.f32 %v1010_v38, %v1027_v51 }
 0xb50   : > { %1030 = vrot.lane.b32.xlu0 %v1028_v53, %s1473_s30  ;;  %v1040_v11 = vmul.f32 %v1039_v23, %v1035_v7 }
 0xb54   : > { %1074 = vrot.lane.b32.xlu0 %v1072_v54, %s1473_s30 }
 0xbc2   : > { %v1031_v59 = vpop.permute.xlu0 %1030 }
 0xbc3   : > { %v1033_v60 = vsub.f32 %v1027_v51, %v1031_v59 }
 0xbc5   : > { %v1034_v61 = vmax.f32 %v1033_v60, 0.0 }
 0xbc6   : > { %v1075_v0 = vpop.permute.xlu0 %1074 }
 0xbc7   : > { %v1041_v1 = vadd.f32 1e-05, %v1034_v61  ;;  %v1077_v3 = vmul.f32 %v1075_v0, %v1068_v63 }
 0xbc9   : > { %1417 = vrsqrt.f32 %v1041_v1  ;;  %1079 = vrot.lane.b32.xlu0 %v1077_v3, %s1472_s29 }
 0xbd6   : > { %v1418_v4 = vpop.eup %1417 }
 0xbd7   : > { %v1046_v62 = vrot.slane %v1418_v4, %v1582_v9  ;;  %v1088_v9 = vrot.slane %v1663_v55, %v796_v50 }
 0xbd9   : > { %1048 = vrot.lane.b32.xlu1 %v1046_v62, %s1472_s29 }
 0xc3b   : > { %v1080_v5 = vpop.permute.xlu0 %1079 }
 0xc3c   : > { %v1082_v25 = vsel %vm364_vm11, %v1080_v5, 0.0 }
 0xc3d   : > { %1083 = vadd.xlane.f32.xlu1 %v1082_v25 }
 0xc4b   : > { %v1049_v13 = vpop.permute.xlu1 %1048 }
 0xc4c   : > { %v1051_v14 = vmul.f32 %v1049_v13, %v1040_v11 }
 0xc4e   : > { %v1056_v15 = vadd.f32 %v1055_v12, %v1051_v14 }
 0xc50   : > { %v1057_v16 = vmax.f32 %v1056_v15, 0.0 }
 0xc52   : > { %v1089_v17 = vmul.f32 %v1088_v9, %v1057_v16 }
 0xc54   : > { %v1090_v18 = vsel %vm364_vm11, %v1089_v17, 0.0 }
 0xc55   : > { %1091 = vadd.xlane.f32.xlu0 %v1090_v18 }
 0xcc6   : > { %v1084_v19 = vpop.xlane.xlu1 %1083 }
 0xcde   : > { %v1092_v20 = vpop.xlane.xlu0 %1091 }
 0xcdf   : > { %v1093_v21 = vadd.f32 %v1092_v20, %v1084_v19 }
 0xce1   : > { %v1098_v22 = vadd.f32 %v1097_v10, %v1093_v21 }
 0xce3   : > { %v1201_v52 = vmul.f32 -1.442695, %v1098_v22 }
 0xce5   : > { %1419 = vpow2.f32 %v1201_v52 }
 0xcf2   : > { %v1420_v24 = vpop.eup %1419 }
 0xcf3   : > { %v1102_v26 = vadd.f32 1.0, %v1420_v24 }
 0xcf5   : > { %1421 = vrcp.f32 %v1102_v26 }
 0xd02   : > { %v1422_v8 = vpop.eup %1421 }
 0xd03   : > { %1106 = vst.msk [vmem:[%s197_s7] sm:$0xff] %vm1105_vm13, %v1422_v8 }
 0xd04 PF: > { %s14_s12 = sadd.s32 1, %s1459_s12  }
 0xd05   : > { %p11_p1 = scmp.ge.s32.totalorder %s14_s12, 6  }
 0xd07   :  { %13 = sbr.rel (!%p11_p1) target bundleno = 1 (0x1), region = 70 }
 0xd0c   :  { %1126 = vsyncpa [#allocation3], 1 }
 0xd0d   :  { %1128 = vsyncpa [#allocation3 + $0x1], 1 }

</bundles_post_ra>
